<compile_context>
chip_gen: v6e
topology: v6e:2x2x1
jax: 0.10.0
libtpu: 0.0.40
codegen_flags: <defaults>
</compile_context>

<pallas_src>
import functools

import jax
import jax.numpy as jnp
from jax.experimental import pallas as pl
from jax.experimental.pallas import tpu as pltpu

LN_EPS = 1e-5  # nn.LayerNorm default


def _round_up(x, m):
    return ((x + m - 1) // m) * m


def _layer_norm_relu(h, gamma, beta):
    # One-pass LayerNorm: E[x] and E[x^2] are independent reductions (issued
    # back-to-back through the XLU); variance = E[x^2] - mu^2, all in f32.
    mu = jnp.mean(h, axis=-1, keepdims=True)
    ms = jnp.mean(h * h, axis=-1, keepdims=True)
    var = jnp.maximum(ms - mu * mu, 0.0)
    y = (h - mu) * jax.lax.rsqrt(var + LN_EPS) * gamma + beta
    return jnp.maximum(y, 0.0)


def actor_kernel(
    x_ref,      # [bm, k_pad]        f32 (state, K zero-padded)
    w1_ref,     # [k_pad, fc1_dim]   weight dtype (bf16 by default)
    w2_ref,     # [fc1_dim, fc2_dim]
    w3_ref,     # [fc2_dim, n_pad]   (N zero-padded to lane-dense width)
    vec_ref,    # [8, vec_dim]       f32: b1,g1,be1,b2,g2,be2,b3,0 (lane-padded)
    out_ref,    # [bm, n_pad]        f32
):
    fc1_dim = w1_ref.shape[1]
    fc2_dim = w2_ref.shape[1]
    n_pad = w3_ref.shape[1]
    wdt = w1_ref.dtype  # matmul operand dtype (bf16 -> native MXU path)

    x = x_ref[...]
    vec = vec_ref[...]
    b1, g1, be1 = vec[0:1, :fc1_dim], vec[1:2, :fc1_dim], vec[2:3, :fc1_dim]
    b2, g2, be2 = vec[3:4, :fc2_dim], vec[4:5, :fc2_dim], vec[5:6, :fc2_dim]
    b3 = vec[6:7, :n_pad]

    # fc1 -> LayerNorm -> relu   (f32 accumulate, f32 elementwise)
    h1 = jnp.dot(x.astype(wdt), w1_ref[...],
                 preferred_element_type=jnp.float32) + b1
    h1 = _layer_norm_relu(h1, g1, be1)

    # fc2 -> LayerNorm -> relu
    h2 = jnp.dot(h1.astype(wdt), w2_ref[...],
                 preferred_element_type=jnp.float32) + b2
    h2 = _layer_norm_relu(h2, g2, be2)

    # action head -> tanh (padded output columns are tanh(0) = 0, sliced away
    # in the wrapper)
    a = jnp.dot(h2.astype(wdt), w3_ref[...],
                preferred_element_type=jnp.float32) + b3
    out_ref[...] = jnp.tanh(a).astype(out_ref.dtype)


@functools.partial(jax.jit, static_argnames=("block_m",))
def actor_forward(state, params, *, block_m=128):
    """Fused Actor forward. state: [B, state_dim] float32 -> [B, action_dim]."""
    B, state_dim = state.shape
    w1, w2, w3 = params["w1"], params["w2"], params["w3"]
    fc1_dim = w1.shape[1]
    fc2_dim = w2.shape[1]
    action_dim = w3.shape[1]

    # ---- wrapper-side padding (lane-dense I/O, full-width first matmul) ----
    k_pad = _round_up(state_dim, 128)       # contraction depth of first dot
    n_pad = _round_up(action_dim, 128)      # lane-dense output store
    bm = min(_round_up(block_m, 8), _round_up(B, 8))  # don't over-pad tiny B
    b_pad = _round_up(B, bm)

    x = jnp.pad(state.astype(jnp.float32),
                ((0, b_pad - B), (0, k_pad - state_dim)))
    w1p = jnp.pad(w1, ((0, k_pad - state_dim), (0, 0)))
    w3p = jnp.pad(w3, ((0, 0), (0, n_pad - action_dim)))

    # Pack the 7 small per-feature vectors into a single [8, vec_dim] block.
    vec_dim = max(fc1_dim, fc2_dim, n_pad)

    def row(v):
        v = v.reshape(1, -1).astype(jnp.float32)
        return jnp.pad(v, ((0, 0), (0, vec_dim - v.shape[1])))

    vec = jnp.concatenate(
        [row(params["b1"]), row(params["g1"]), row(params["be1"]),
         row(params["b2"]), row(params["g2"]), row(params["be2"]),
         row(params["b3"]), jnp.zeros((1, vec_dim), jnp.float32)],
        axis=0)

    grid = (b_pad // bm,)

    def bcast(shape):
        # constant params: same block every grid step (no re-DMA)
        return pl.BlockSpec(shape, lambda i: tuple(0 for _ in shape))

    in_specs = [
        pl.BlockSpec((bm, k_pad), lambda i: (i, 0)),   # state tile
        bcast((k_pad, fc1_dim)),                       # w1 (K-padded)
        bcast((fc1_dim, fc2_dim)),                     # w2
        bcast((fc2_dim, n_pad)),                       # w3 (N-padded)
        bcast((8, vec_dim)),                           # packed b/gamma/beta
    ]
    out_specs = pl.BlockSpec((bm, n_pad), lambda i: (i, 0))

    out_padded = pl.pallas_call(
        actor_kernel,
        out_shape=jax.ShapeDtypeStruct((b_pad, n_pad), jnp.float32),
        grid_spec=pltpu.PrefetchScalarGridSpec(
            num_scalar_prefetch=0,
            grid=grid,
            in_specs=in_specs,
            out_specs=out_specs,
        ),
        compiler_params=pltpu.CompilerParams(
            dimension_semantics=("parallel",),  # batch tiles shard over TCs
        ),
    )(x, w1p, w2, w3p, vec)

    return out_padded[:B, :action_dim]


def init_actor_params(key, state_dim, fc1_dim, fc2_dim, action_dim,
                      weight_dtype=jnp.bfloat16):
    """Deterministic init matching weight_init: xavier_normal_ weights, zero
    biases; LayerNorm gamma=1, beta=0. Weights stored [in, out]; bf16 by
    default (f32 accumulation in the kernel), pass float32 for exact PyTorch
    numerics."""
    k1, k2, k3 = jax.random.split(key, 3)

    def xavier_normal(k, fan_in, fan_out):
        std = jnp.sqrt(2.0 / (fan_in + fan_out))
        w = std * jax.random.normal(k, (fan_in, fan_out), dtype=jnp.float32)
        return w.astype(weight_dtype)

    return {
        "w1": xavier_normal(k1, state_dim, fc1_dim),
        "b1": jnp.zeros((fc1_dim,), jnp.float32),
        "g1": jnp.ones((fc1_dim,), jnp.float32),
        "be1": jnp.zeros((fc1_dim,), jnp.float32),
        "w2": xavier_normal(k2, fc1_dim, fc2_dim),
        "b2": jnp.zeros((fc2_dim,), jnp.float32),
        "g2": jnp.ones((fc2_dim,), jnp.float32),
        "be2": jnp.zeros((fc2_dim,), jnp.float32),
        "w3": xavier_normal(k3, fc2_dim, action_dim),
        "b3": jnp.zeros((action_dim,), jnp.float32),
    }


def actor_forward_ref(state, params):
    """Pure-JAX reference with the same operand dtypes as the kernel
    (bf16 matmul operands, f32 accumulation, f32 LayerNorm/relu/tanh)."""
    wdt = params["w1"].dtype

    def dot(x, w):
        return jnp.dot(x.astype(wdt), w, preferred_element_type=jnp.float32)

    def ln(h, g, b):
        mu = jnp.mean(h, axis=-1, keepdims=True)
        var = jnp.mean(jnp.square(h - mu), axis=-1, keepdims=True)
        return (h - mu) * jax.lax.rsqrt(var + LN_EPS) * g + b

    h = dot(state, params["w1"]) + params["b1"]
    h = jnp.maximum(ln(h, params["g1"], params["be1"]), 0.0)
    h = dot(h, params["w2"]) + params["b2"]
    h = jnp.maximum(ln(h, params["g2"], params["be2"]), 0.0)
    return jnp.tanh(dot(h, params["w3"]) + params["b3"])


if __name__ == "__main__":
    B, state_dim, fc1_dim, fc2_dim, action_dim = 8, 16, 128, 128, 8

    key = jax.random.PRNGKey(0)
    k_params, k_state = jax.random.split(key)
    params = init_actor_params(k_params, state_dim, fc1_dim, fc2_dim, action_dim)
    state = jax.random.normal(k_state, (B, state_dim), dtype=jnp.float32)

    action = actor_forward(state, params)
    action = jax.block_until_ready(action)

    ref = actor_forward_ref(state, params)
    assert action.shape == (B, action_dim)
    assert jnp.allclose(action, ref, atol=2e-3, rtol=2e-3), "mismatch vs reference"

    print("KERNEL_OK")
</pallas_src>

<mosaic_0001>
module attributes {stable_mosaic.version = 11 : i64} {
  func.func @actor_kernel(%arg0: i32, %arg1: memref<8x128xf32, #tpu.memory_space<vmem>>, %arg2: memref<128x128xbf16, #tpu.memory_space<vmem>>, %arg3: memref<128x128xbf16, #tpu.memory_space<vmem>>, %arg4: memref<128x128xbf16, #tpu.memory_space<vmem>>, %arg5: memref<8x128xf32, #tpu.memory_space<vmem>>, %arg6: memref<8x128xf32, #tpu.memory_space<vmem>>) attributes {dimension_semantics = [#tpu.dimension_semantics<parallel>], iteration_bounds = array<i64: 1>, scalar_prefetch = 0 : i64, scratch_operands = 0 : i64, tpu.core_type = #tpu.core_type<tc>, window_params = [{transform_indices = @transform_0, window_bounds = array<i64: 8, 128>}, {pipeline_mode = #tpu.pipeline_mode<synchronous>, transform_indices = @transform_1, window_bounds = array<i64: 128, 128>}, {pipeline_mode = #tpu.pipeline_mode<synchronous>, transform_indices = @transform_2, window_bounds = array<i64: 128, 128>}, {pipeline_mode = #tpu.pipeline_mode<synchronous>, transform_indices = @transform_3, window_bounds = array<i64: 128, 128>}, {pipeline_mode = #tpu.pipeline_mode<synchronous>, transform_indices = @transform_4, window_bounds = array<i64: 8, 128>}, {transform_indices = @transform_5, window_bounds = array<i64: 8, 128>}]} {
    %c0 = arith.constant 0 : index
    %c0_0 = arith.constant 0 : index
    %0 = vector.load %arg1[%c0, %c0_0] : memref<8x128xf32, #tpu.memory_space<vmem>>, vector<8x128xf32>
    %c0_1 = arith.constant 0 : index
    %c0_2 = arith.constant 0 : index
    %1 = vector.load %arg5[%c0_1, %c0_2] : memref<8x128xf32, #tpu.memory_space<vmem>>, vector<8x128xf32>
    %2 = vector.extract_strided_slice %1 {offsets = [0, 0], sizes = [1, 128], strides = [1, 1]} : vector<8x128xf32> to vector<1x128xf32>
    %3 = vector.extract_strided_slice %1 {offsets = [1, 0], sizes = [1, 128], strides = [1, 1]} : vector<8x128xf32> to vector<1x128xf32>
    %4 = vector.extract_strided_slice %1 {offsets = [2, 0], sizes = [1, 128], strides = [1, 1]} : vector<8x128xf32> to vector<1x128xf32>
    %5 = vector.extract_strided_slice %1 {offsets = [3, 0], sizes = [1, 128], strides = [1, 1]} : vector<8x128xf32> to vector<1x128xf32>
    %6 = vector.extract_strided_slice %1 {offsets = [4, 0], sizes = [1, 128], strides = [1, 1]} : vector<8x128xf32> to vector<1x128xf32>
    %7 = vector.extract_strided_slice %1 {offsets = [5, 0], sizes = [1, 128], strides = [1, 1]} : vector<8x128xf32> to vector<1x128xf32>
    %8 = vector.extract_strided_slice %1 {offsets = [6, 0], sizes = [1, 128], strides = [1, 1]} : vector<8x128xf32> to vector<1x128xf32>
    %9 = arith.truncf %0 : vector<8x128xf32> to vector<8x128xbf16>
    %c0_3 = arith.constant 0 : index
    %c0_4 = arith.constant 0 : index
    %10 = vector.load %arg2[%c0_3, %c0_4] : memref<128x128xbf16, #tpu.memory_space<vmem>>, vector<128x128xbf16>
    %cst = arith.constant dense<0.000000e+00> : vector<8x128xf32>
    %11 = tpu.matmul %9, %10, %cst {dimension_numbers = #tpu.dot_dimension_numbers<[1], [0], [0], [1], [0, 0, 1, 1], [], []>} : vector<8x128xbf16>, vector<128x128xbf16>, vector<8x128xf32> -> vector<8x128xf32>
    %12 = vector.broadcast %2 : vector<1x128xf32> to vector<8x128xf32>
    %13 = arith.addf %11, %12 : vector<8x128xf32>
    %cst_5 = arith.constant dense<0.000000e+00> : vector<8xf32>
    %14 = vector.multi_reduction <add>, %13, %cst_5 [1] : vector<8x128xf32> to vector<8xf32>
    %15 = vector.shape_cast %14 : vector<8xf32> to vector<8x1xf32>
    %cst_6 = arith.constant 1.280000e+02 : f32
    %16 = vector.broadcast %cst_6 : f32 to vector<8x1xf32>
    %17 = arith.divf %15, %16 : vector<8x1xf32>
    %18 = arith.mulf %13, %13 : vector<8x128xf32>
    %cst_7 = arith.constant dense<0.000000e+00> : vector<8xf32>
    %19 = vector.multi_reduction <add>, %18, %cst_7 [1] : vector<8x128xf32> to vector<8xf32>
    %20 = vector.shape_cast %19 : vector<8xf32> to vector<8x1xf32>
    %cst_8 = arith.constant 1.280000e+02 : f32
    %21 = vector.broadcast %cst_8 : f32 to vector<8x1xf32>
    %22 = arith.divf %20, %21 : vector<8x1xf32>
    %23 = arith.mulf %17, %17 : vector<8x1xf32>
    %24 = arith.subf %22, %23 : vector<8x1xf32>
    %cst_9 = arith.constant 0.000000e+00 : f32
    %25 = vector.broadcast %cst_9 : f32 to vector<8x1xf32>
    %26 = arith.maximumf %24, %25 : vector<8x1xf32>
    %27 = vector.broadcast %17 : vector<8x1xf32> to vector<8x128xf32>
    %28 = arith.subf %13, %27 : vector<8x128xf32>
    %cst_10 = arith.constant 9.99999974E-6 : f32
    %29 = vector.broadcast %cst_10 : f32 to vector<8x1xf32>
    %30 = arith.addf %26, %29 : vector<8x1xf32>
    %31 = math.rsqrt %30 : vector<8x1xf32>
    %32 = vector.broadcast %31 : vector<8x1xf32> to vector<8x128xf32>
    %33 = arith.mulf %28, %32 : vector<8x128xf32>
    %34 = vector.broadcast %3 : vector<1x128xf32> to vector<8x128xf32>
    %35 = arith.mulf %33, %34 : vector<8x128xf32>
    %36 = vector.broadcast %4 : vector<1x128xf32> to vector<8x128xf32>
    %37 = arith.addf %35, %36 : vector<8x128xf32>
    %cst_11 = arith.constant 0.000000e+00 : f32
    %38 = vector.broadcast %cst_11 : f32 to vector<8x128xf32>
    %39 = arith.maximumf %37, %38 : vector<8x128xf32>
    %40 = arith.truncf %39 : vector<8x128xf32> to vector<8x128xbf16>
    %c0_12 = arith.constant 0 : index
    %c0_13 = arith.constant 0 : index
    %41 = vector.load %arg3[%c0_12, %c0_13] : memref<128x128xbf16, #tpu.memory_space<vmem>>, vector<128x128xbf16>
    %cst_14 = arith.constant dense<0.000000e+00> : vector<8x128xf32>
    %42 = tpu.matmul %40, %41, %cst_14 {dimension_numbers = #tpu.dot_dimension_numbers<[1], [0], [0], [1], [0, 0, 1, 1], [], []>} : vector<8x128xbf16>, vector<128x128xbf16>, vector<8x128xf32> -> vector<8x128xf32>
    %43 = vector.broadcast %5 : vector<1x128xf32> to vector<8x128xf32>
    %44 = arith.addf %42, %43 : vector<8x128xf32>
    %cst_15 = arith.constant dense<0.000000e+00> : vector<8xf32>
    %45 = vector.multi_reduction <add>, %44, %cst_15 [1] : vector<8x128xf32> to vector<8xf32>
    %46 = vector.shape_cast %45 : vector<8xf32> to vector<8x1xf32>
    %cst_16 = arith.constant 1.280000e+02 : f32
    %47 = vector.broadcast %cst_16 : f32 to vector<8x1xf32>
    %48 = arith.divf %46, %47 : vector<8x1xf32>
    %49 = arith.mulf %44, %44 : vector<8x128xf32>
    %cst_17 = arith.constant dense<0.000000e+00> : vector<8xf32>
    %50 = vector.multi_reduction <add>, %49, %cst_17 [1] : vector<8x128xf32> to vector<8xf32>
    %51 = vector.shape_cast %50 : vector<8xf32> to vector<8x1xf32>
    %cst_18 = arith.constant 1.280000e+02 : f32
    %52 = vector.broadcast %cst_18 : f32 to vector<8x1xf32>
    %53 = arith.divf %51, %52 : vector<8x1xf32>
    %54 = arith.mulf %48, %48 : vector<8x1xf32>
    %55 = arith.subf %53, %54 : vector<8x1xf32>
    %cst_19 = arith.constant 0.000000e+00 : f32
    %56 = vector.broadcast %cst_19 : f32 to vector<8x1xf32>
    %57 = arith.maximumf %55, %56 : vector<8x1xf32>
    %58 = vector.broadcast %48 : vector<8x1xf32> to vector<8x128xf32>
    %59 = arith.subf %44, %58 : vector<8x128xf32>
    %cst_20 = arith.constant 9.99999974E-6 : f32
    %60 = vector.broadcast %cst_20 : f32 to vector<8x1xf32>
    %61 = arith.addf %57, %60 : vector<8x1xf32>
    %62 = math.rsqrt %61 : vector<8x1xf32>
    %63 = vector.broadcast %62 : vector<8x1xf32> to vector<8x128xf32>
    %64 = arith.mulf %59, %63 : vector<8x128xf32>
    %65 = vector.broadcast %6 : vector<1x128xf32> to vector<8x128xf32>
    %66 = arith.mulf %64, %65 : vector<8x128xf32>
    %67 = vector.broadcast %7 : vector<1x128xf32> to vector<8x128xf32>
    %68 = arith.addf %66, %67 : vector<8x128xf32>
    %cst_21 = arith.constant 0.000000e+00 : f32
    %69 = vector.broadcast %cst_21 : f32 to vector<8x128xf32>
    %70 = arith.maximumf %68, %69 : vector<8x128xf32>
    %71 = arith.truncf %70 : vector<8x128xf32> to vector<8x128xbf16>
    %c0_22 = arith.constant 0 : index
    %c0_23 = arith.constant 0 : index
    %72 = vector.load %arg4[%c0_22, %c0_23] : memref<128x128xbf16, #tpu.memory_space<vmem>>, vector<128x128xbf16>
    %cst_24 = arith.constant dense<0.000000e+00> : vector<8x128xf32>
    %73 = tpu.matmul %71, %72, %cst_24 {dimension_numbers = #tpu.dot_dimension_numbers<[1], [0], [0], [1], [0, 0, 1, 1], [], []>} : vector<8x128xbf16>, vector<128x128xbf16>, vector<8x128xf32> -> vector<8x128xf32>
    %74 = vector.broadcast %8 : vector<1x128xf32> to vector<8x128xf32>
    %75 = arith.addf %73, %74 : vector<8x128xf32>
    %76 = math.tanh %75 : vector<8x128xf32>
    %c0_25 = arith.constant 0 : index
    %c0_26 = arith.constant 0 : index
    %77 = vector.load %arg6[%c0_25, %c0_26] : memref<8x128xf32, #tpu.memory_space<vmem>>, vector<8x128xf32>
    tpu.vector_store %arg6[%c0_25, %c0_26], %76 {strides = array<i32>} : memref<8x128xf32, #tpu.memory_space<vmem>>, vector<8x128xf32>,
    return
  }
  func.func @transform_0(%arg0: i32) -> (i32, i32) {
    %c0_i32 = arith.constant 0 : i32
    %c0_i32_0 = arith.constant 0 : i32
    return %arg0, %c0_i32 : i32, i32
  }
  func.func @transform_1(%arg0: i32) -> (i32, i32) {
    %c0_i32 = arith.constant 0 : i32
    %c0_i32_0 = arith.constant 0 : i32
    %c0_i32_1 = arith.constant 0 : i32
    return %c0_i32, %c0_i32_0 : i32, i32
  }
  func.func @transform_2(%arg0: i32) -> (i32, i32) {
    %c0_i32 = arith.constant 0 : i32
    %c0_i32_0 = arith.constant 0 : i32
    %c0_i32_1 = arith.constant 0 : i32
    return %c0_i32, %c0_i32_0 : i32, i32
  }
  func.func @transform_3(%arg0: i32) -> (i32, i32) {
    %c0_i32 = arith.constant 0 : i32
    %c0_i32_0 = arith.constant 0 : i32
    %c0_i32_1 = arith.constant 0 : i32
    return %c0_i32, %c0_i32_0 : i32, i32
  }
  func.func @transform_4(%arg0: i32) -> (i32, i32) {
    %c0_i32 = arith.constant 0 : i32
    %c0_i32_0 = arith.constant 0 : i32
    %c0_i32_1 = arith.constant 0 : i32
    return %c0_i32, %c0_i32_0 : i32, i32
  }
  func.func @transform_5(%arg0: i32) -> (i32, i32) {
    %c0_i32 = arith.constant 0 : i32
    %c0_i32_0 = arith.constant 0 : i32
    return %arg0, %c0_i32 : i32, i32
  }
}

</mosaic_0001>

<bundles_post_ra>
// kernel: actor_forward.1
= control target key start
LH: loop header
LB: loop body
LE: loop exit
PB: predicated region body
PF: predicated region fallthrough
CT: control target
= control target key end

     0   :  { %v584_v1 = vmov 0.0   ;;  %vm585_vm0 = vmmov 0   ;;  %s746_s0 = inlined_call_operand.vmem [shape: f32[8,128], index: 0, kind: input, shape index: {}]   ;;  %s747_s1 = inlined_call_operand.vmem [shape: bf16[128,128], index: 1, kind: input, shape index: {}]   ;;  %s748_s2 = inlined_call_operand.vmem [shape: bf16[128,128], index: 2, kind: input, shape index: {}]   ;;  %s749_s3 = inlined_call_operand.vmem [shape: bf16[128,128], index: 3, kind: input, shape index: {}]   ;;  %s750_s4 = inlined_call_operand.vmem [shape: f32[8,128], index: 4, kind: input, shape index: {}]   ;;  %s751_s5 = inlined_call_operand.hbm [shape: f32[8,128], index: 5, kind: output, shape index: {}]  }
   0x1   :  { %v532_v0 = vld [vmem:[%s747_s1 + $0x38] sm:$0xff]   ;;  %469 = vmatprep.subr.bf16.mxu0 %v584_v1  ;;  %489 = vmatprep.subr.bf16.mxu1 %v584_v1  ;;  %v533_v2 = vld [vmem:[%s747_s1 + $0x30] sm:$0xff]   ;;  %v534_v3 = vld [vmem:[%s747_s1 + $0x28] sm:$0xff]  }
   0x2   :  { %470 = vmatpush3.bf16.msra.mxu0 %v532_v0  ;;  %485 = vmatprep.mubr.msk.bf16.mxu0 %vm585_vm0, %v584_v1  ;;  %v535_v4 = vld [vmem:[%s747_s1 + $0x20] sm:$0xff]   ;;  %v536_v5 = vld [vmem:[%s747_s1 + $0x18] sm:$0xff]   ;;  %v537_v6 = vld [vmem:[%s747_s1 + $0x10] sm:$0xff]  }
   0x3   :  { %471 = vmatprep.subr.bf16.mxu0 %v584_v1  ;;  %505 = vmatprep.mubr.msk.bf16.mxu1 %vm585_vm0, %v584_v1 }
   0x6   :  { %472 = vmatpush3.bf16.msra.mxu0 %v533_v2 }
   0x7   :  { %473 = vmatprep.subr.bf16.mxu0 %v584_v1 }
   0xa   :  { %474 = vmatpush3.bf16.msra.mxu0 %v534_v3 }
   0xb   :  { %475 = vmatprep.subr.bf16.mxu0 %v584_v1 }
   0xe   :  { %476 = vmatpush3.bf16.msra.mxu0 %v535_v4 }
   0xf   :  { %477 = vmatprep.subr.bf16.mxu0 %v584_v1 }
  0x12   :  { %478 = vmatpush3.bf16.msra.mxu0 %v536_v5 }
  0x13   :  { %479 = vmatprep.subr.bf16.mxu0 %v584_v1 }
  0x14   :  { %10 = vsyncpa [#allocation3], 0  ;;  %v538_v7 = vld [vmem:[%s747_s1 + $0x8] sm:$0xff]   ;;  %v539_v8 = vld [vmem:[%s747_s1] sm:$0xff]   ;;  %v41_v11 = vlaneseq }
  0x15   :  { %v22_v9 = vld [vmem:[%s746_s0] sm:$0xff]  ;;  %v540_v22 = vld [vmem:[%s748_s2 + $0x38] sm:$0xff]   ;;  %v541_v23 = vld [vmem:[%s748_s2 + $0x30] sm:$0xff]  }
  0x16   :  { %480 = vmatpush3.bf16.msra.mxu0 %v537_v6  ;;  %v24_v10 = vpack.c.bf16 %v22_v9, %v22_v9  ;;  %v660_v12 = vshrl.u32 %v41_v11, 7  ;;  %v666_v14 = vld [vmem:[%s750_s4] sm:$0xff]  ;;  %490 = vmatpush3.bf16.msra.mxu1 %v540_v22  ;;  %v542_v24 = vld [vmem:[%s748_s2 + $0x28] sm:$0xff]   ;;  %v544_v26 = vld [vmem:[%s748_s2 + $0x18] sm:$0xff]  }
  0x17   :  { %481 = vmatprep.subr.bf16.mxu0 %v584_v1  ;;  %491 = vmatprep.subr.bf16.mxu1 %v584_v1  ;;  %v543_v25 = vld [vmem:[%s748_s2 + $0x20] sm:$0xff]   ;;  %v545_v27 = vld [vmem:[%s748_s2 + $0x10] sm:$0xff]   ;;  %v546_v28 = vld [vmem:[%s748_s2 + $0x8] sm:$0xff]  }
  0x18   :  { %v43_v13 = vsub.s32 0, %v660_v12  ;;  %v547_v29 = vld [vmem:[%s748_s2] sm:$0xff]   ;;  %v150_v38 = vsub.s32 1, %v660_v12  ;;  %v155_v39 = vsub.s32 2, %v660_v12  ;;  %v178_v49 = vsub.s32 3, %v660_v12  ;;  %v548_v57 = vld [vmem:[%s749_s3 + $0x38] sm:$0xff]  }
  0x19   :  { %v549_v58 = vld [vmem:[%s749_s3 + $0x30] sm:$0xff]   ;;  %v550_v59 = vld [vmem:[%s749_s3 + $0x28] sm:$0xff]   ;;  %v551_v60 = vld [vmem:[%s749_s3 + $0x20] sm:$0xff]   ;;  %v289_v11 = vsub.s32 5, %v660_v12  ;;  %v312_v22 = vsub.s32 6, %v660_v12 }
  0x1a   :  { %482 = vmatpush3.bf16.msra.mxu0 %v538_v7  ;;  %v44_v15 = vrot.slane %v666_v14, %v43_v13  ;;  %492 = vmatpush3.bf16.msra.mxu1 %v541_v23  ;;  %v151_v41 = vrot.slane %v666_v14, %v150_v38  ;;  %v156_v44 = vrot.slane %v666_v14, %v155_v39  ;;  %v552_v61 = vld [vmem:[%s749_s3 + $0x18] sm:$0xff]   ;;  %v553_v62 = vld [vmem:[%s749_s3 + $0x10] sm:$0xff]   ;;  %v554_v63 = vld [vmem:[%s749_s3 + $0x8] sm:$0xff]  }
  0x1b   :  { %483 = vmatprep.subr.bf16.mxu0 %v584_v1  ;;  %493 = vmatprep.subr.bf16.mxu1 %v584_v1  ;;  %v179_v50 = vrot.slane %v666_v14, %v178_v49  ;;  %v555_v0 = vld [vmem:[%s749_s3] sm:$0xff]   ;;  %v313_v23 = vrot.slane %v666_v14, %v312_v22  ;;  %s586_s3 = smov [#allocation2]  }
  0x1c   :  { %s410_s4 = sshll.u32 %s586_s3, 4  ;;  %s411_s4 = int_to_ptr.vmem [resolvable:$true] %s410_s4 }
  0x1d   :  { %s562_s14 = scalar_lea.vmem %s411_s4, 128  ;;  %p567_p1 = scmp.lt.s32.totalorder %s411_s4, %s411_s4 }
  0x1e   :  { %484 = vmatpush3.bf16.msra.mxu0 %v539_v8  ;;  %494 = vmatpush3.bf16.msra.mxu1 %v542_v24  ;;  %p563_p0 = scmp.ne.s32.totalorder %s411_s4, %s562_s14  ;;  %p568_p2 = scmp.lt.s32.totalorder %s562_s14, %s562_s14 }
  0x1f   :  { %509 = vmatprep.subr.bf16.mxu0 %v584_v1  ;;  %495 = vmatprep.subr.bf16.mxu1 %v584_v1 }
  0x20   :  { %p569_p3 = por %p568_p2, %p567_p1 }
  0x21   :  { %486 = vmatmul.mubr.bf16.vlgmr.msra.gmra.mxu0 %v24_v10  ;;  %v284_v10 = vsub.s32 4, %v660_v12 }
  0x22   :  { %525 = vmatprep.mubr.msk.bf16.mxu0 %vm585_vm0, %v584_v1  ;;  %496 = vmatpush3.bf16.msra.mxu1 %v543_v25  ;;  %p570_p4 = pnand %p569_p3, %p563_p0 }
  0x23   :  { %497 = vmatprep.subr.bf16.mxu1 %v584_v1  ;;  %510 = vmatpush3.bf16.msra.mxu0 %v548_v57 }
  0x24   :  { %511 = vmatprep.subr.bf16.mxu0 %v584_v1 }
  0x26   :  { %498 = vmatpush3.bf16.msra.mxu1 %v544_v26 }
  0x27   :  { %499 = vmatprep.subr.bf16.mxu1 %v584_v1  ;;  %512 = vmatpush3.bf16.msra.mxu0 %v549_v58 }
  0x28   :  { %513 = vmatprep.subr.bf16.mxu0 %v584_v1 }
  0x2a   :  { %500 = vmatpush3.bf16.msra.mxu1 %v545_v27 }
  0x2b   :  { %501 = vmatprep.subr.bf16.mxu1 %v584_v1  ;;  %514 = vmatpush3.bf16.msra.mxu0 %v550_v59 }
  0x2c   :  { %515 = vmatprep.subr.bf16.mxu0 %v584_v1 }
  0x2e   :  { %502 = vmatpush3.bf16.msra.mxu1 %v546_v28 }
  0x2f   :  { %503 = vmatprep.subr.bf16.mxu1 %v584_v1  ;;  %516 = vmatpush3.bf16.msra.mxu0 %v551_v60 }
  0x30   :  { %517 = vmatprep.subr.bf16.mxu0 %v584_v1 }
  0x32   :  { %504 = vmatpush3.bf16.msra.mxu1 %v547_v29 }
  0x33   :  { %518 = vmatpush3.bf16.msra.mxu0 %v552_v61 }
  0x34   :  { %519 = vmatprep.subr.bf16.mxu0 %v584_v1 }
  0x37   :  { %520 = vmatpush3.bf16.msra.mxu0 %v553_v62 }
  0x38   :  { %521 = vmatprep.subr.bf16.mxu0 %v584_v1 }
  0x3b   :  { %522 = vmatpush3.bf16.msra.mxu0 %v554_v63 }
  0x3c   :  { %523 = vmatprep.subr.bf16.mxu0 %v584_v1  ;;  %v290_v1 = vrot.slane %v666_v14, %v289_v11 }
  0x3f   :  { %524 = vmatpush3.bf16.msra.mxu0 %v555_v0 }
  0xe1   :  { %v127_v16 = vpop.f32.mrf.mxu0 }
  0xe2   :  { %v128_v17 = vadd.f32 %v127_v16, %v44_v15  ;;  %v285_v15 = vrot.slane %v666_v14, %v284_v10 }
  0xe3   :  { %v487_v18 = vpop.f32.mrf.mxu0 }
  0xe4   :  { %133 = vadd.xlane.f32.xlu0 %v128_v17  ;;  %v137_v20 = vmul.f32 %v128_v17, %v128_v17 }
  0xe5   :  { %v130_v19 = vpop.f32.mrf.mxu0 }
  0xe7   :  { %v488_v21 = vpop.f32.mrf.mxu0 }
  0xe8   :  { %138 = vadd.xlane.f32.xlu0 %v137_v20 }
 0x16d   :  { %v134_v30 = vpop.xlane.xlu0 %133 }
 0x16e   :  { %v136_v31 = vmul.f32 0.0078125, %v134_v30 }
 0x170   :  { %v141_v33 = vmul.f32 %v136_v31, %v136_v31  ;;  %v144_v40 = vsub.f32 %v128_v17, %v136_v31 }
 0x171   :  { %v139_v32 = vpop.xlane.xlu0 %138 }
 0x172   :  { %v140_v34 = vmul.f32 0.0078125, %v139_v32 }
 0x174   :  { %v142_v35 = vsub.f32 %v140_v34, %v141_v33 }
 0x176   :  { %v143_v36 = vmax.f32 %v142_v35, 0.0 }
 0x178   :  { %v145_v37 = vadd.f32 1e-05, %v143_v36 }
 0x17a   :  { %556 = vrsqrt.f32 %v145_v37 }
 0x187   :  { %v557_v42 = vpop.eup %556 }
 0x188   :  { %v147_v43 = vmul.f32 %v557_v42, %v144_v40 }
 0x18a   :  { %v152_v45 = vmul.f32 %v151_v41, %v147_v43 }
 0x18c   :  { %v157_v46 = vadd.f32 %v156_v44, %v152_v45 }
 0x18e   :  { %v158_v47 = vmax.f32 %v157_v46, 0.0 }
 0x190   :  { %v159_v48 = vpack.c.bf16 %v158_v47, %v158_v47 }
 0x192   :  { %506 = vmatmul.mubr.bf16.vlgmr.msra.gmra.mxu1 %v159_v48 }
 0x252   :  { %v262_v51 = vpop.f32.mrf.mxu1 }
 0x253   :  { %v263_v52 = vadd.f32 %v262_v51, %v179_v50 }
 0x254   :  { %v507_v53 = vpop.f32.mrf.mxu1 }
 0x255   :  { %268 = vadd.xlane.f32.xlu1 %v263_v52  ;;  %v271_v55 = vmul.f32 %v263_v52, %v263_v52 }
 0x256   :  { %v265_v54 = vpop.f32.mrf.mxu1 }
 0x258   :  { %v508_v56 = vpop.f32.mrf.mxu1 }
 0x259   :  { %272 = vadd.xlane.f32.xlu1 %v271_v55 }
 0x2de   :  { %v269_v2 = vpop.xlane.xlu1 %268 }
 0x2df   :  { %v270_v3 = vmul.f32 0.0078125, %v269_v2 }
 0x2e1   :  { %v275_v5 = vmul.f32 %v270_v3, %v270_v3  ;;  %v278_v13 = vsub.f32 %v263_v52, %v270_v3 }
 0x2e2   :  { %v273_v4 = vpop.xlane.xlu1 %272 }
 0x2e3   :  { %v274_v6 = vmul.f32 0.0078125, %v273_v4 }
 0x2e5   :  { %v276_v7 = vsub.f32 %v274_v6, %v275_v5 }
 0x2e7   :  { %v277_v8 = vmax.f32 %v276_v7, 0.0 }
 0x2e9   :  { %v279_v9 = vadd.f32 1e-05, %v277_v8 }
 0x2eb   :  { %558 = vrsqrt.f32 %v279_v9 }
 0x2f8   :  { %v559_v16 = vpop.eup %558 }
 0x2f9   :  { %v281_v17 = vmul.f32 %v559_v16, %v278_v13 }
 0x2fb   :  { %v286_v18 = vmul.f32 %v285_v15, %v281_v17 }
 0x2fd   :  { %v291_v19 = vadd.f32 %v290_v1, %v286_v18 }
 0x2ff   :  { %v292_v20 = vmax.f32 %v291_v19, 0.0 }
 0x301   :  { %v293_v21 = vpack.c.bf16 %v292_v20, %v292_v20 }
 0x303   :  { %526 = vmatmul.mubr.bf16.vlgmr.msra.gmra.mxu0 %v293_v21 }
 0x3c3   :  { %v396_v24 = vpop.f32.mrf.mxu0 }
 0x3c4   :  { %v397_v25 = vadd.f32 %v396_v24, %v313_v23 }
 0x3c5   :  { %v527_v26 = vpop.f32.mrf.mxu0 }
 0x3c6   :  { %560 = vtanh.f32 %v397_v25 }
 0x3c7   :  { %v399_v27 = vpop.f32.mrf.mxu0 }
 0x3c9   :  { %v528_v28 = vpop.f32.mrf.mxu0 }
 0x3d3   :  { %v561_v29 = vpop.eup %560 }
 0x3d4   :  { %403 = vst [vmem:[#allocation2] sm:$0xff] %v561_v29 }
 0x3d5   :  { %573 = shalt.err (!%p570_p4)
}
 0x3d6   :  { %413 = dma.vmem_to_hbm [thread:$0]  %s411_s4, 128, %s751_s5, [#allocation3]  }
 0x3d7   :  { %582 = dma.done.wait [#allocation3], 128  }
 0x3d8   :  { %583 = vsyncadd [#allocation3], 4294967168 }
 0x3d9   :  { %417 = vsyncpa [#allocation3], 1 }

</bundles_post_ra>
